<compile_context>
chip_gen: v7x
topology: tpu7x:2x2x1
jax: 0.10.0
libtpu: 0.0.40
codegen_flags: <defaults>
</compile_context>

<pallas_src>
import math

import jax
import jax.numpy as jnp
from jax.experimental import pallas as pl
from jax.experimental.pallas import tpu as pltpu


def _attend(q, k, v, bias, ctx_ref, attn_ref):
    """Shared attention core on (H, S, d_k) bf16 tiles; bias is f32 or None."""
    # One batched MXU matmul over all heads: (H,Sq,Dk) x (H,Sk,Dk) -> (H,Sq,Sk)
    s = jnp.einsum("hqd,hkd->hqk", q, k, preferred_element_type=jnp.float32)
    if bias is not None:
        s = s + bias[None, :, :]                  # broadcast mask bias over heads

    # numerically-stable softmax in f32; divide -> EUP reciprocal multiply
    m = jnp.max(s, axis=-1, keepdims=True)
    p = jnp.exp(s - m)
    l = jnp.sum(p, axis=-1, keepdims=True)
    attn = p * pl.reciprocal(l, approx=True)
    attn_ref[0] = attn.astype(attn_ref.dtype)

    # (H,Sq,Sk) x (H,Sk,Dk) -> (H,Sq,Dk), single batched MXU matmul (bf16 in)
    ctx = jnp.einsum("hqk,hkd->hqd", attn.astype(v.dtype), v,
                     preferred_element_type=jnp.float32)
    ctx_ref[0] = ctx.astype(ctx_ref.dtype)


def _attention_kernel_masked(q_ref, k_ref, v_ref, mask_ref, ctx_ref, attn_ref):
    # additive mask bias, computed once per batch row
    bias = jnp.where(mask_ref[0] == 0.0, jnp.float32(-1e30), jnp.float32(0.0))
    _attend(q_ref[0], k_ref[0], v_ref[0], bias, ctx_ref, attn_ref)


def _attention_kernel_nomask(q_ref, k_ref, v_ref, ctx_ref, attn_ref):
    _attend(q_ref[0], k_ref[0], v_ref[0], None, ctx_ref, attn_ref)


def scaled_dot_attention(q, k, v, mask=None):
    """q, k, v: (N, S, H, d_k) float32; mask: (N, S_q, S_k) (0 == masked) or None.

    Returns (context (N, S_q, H, d_k), attn (N, H, S_q, S_k)) with the same
    semantics as ScaledDotAttention.forward.
    """
    N, Sq, H, Dk = q.shape
    Sk = k.shape[1]
    inv_sqrt_dk = 1.0 / math.sqrt(Dk)

    # wrapper-side layout plumbing: heads -> leading batch axis so the kernel
    # sees (H, S, d_k) tiles; fold 1/sqrt(d_k) into q and cast MXU operands to
    # bf16 in the same fused XLA op.
    qh = jnp.transpose((q * inv_sqrt_dk).astype(jnp.bfloat16), (0, 2, 1, 3))
    kh = jnp.transpose(k.astype(jnp.bfloat16), (0, 2, 1, 3))
    vh = jnp.transpose(v.astype(jnp.bfloat16), (0, 2, 1, 3))

    qkv_specs = [
        pl.BlockSpec((1, H, Sq, Dk), lambda n: (n, 0, 0, 0)),   # q
        pl.BlockSpec((1, H, Sk, Dk), lambda n: (n, 0, 0, 0)),   # k
        pl.BlockSpec((1, H, Sk, Dk), lambda n: (n, 0, 0, 0)),   # v
    ]
    out_specs = (
        pl.BlockSpec((1, H, Sq, Dk), lambda n: (n, 0, 0, 0)),   # context ('nhqd')
        pl.BlockSpec((1, H, Sq, Sk), lambda n: (n, 0, 0, 0)),   # attn ('nhqk')
    )
    out_shape = (jax.ShapeDtypeStruct((N, H, Sq, Dk), jnp.float32),
                 jax.ShapeDtypeStruct((N, H, Sq, Sk), jnp.float32))
    compiler_params = pltpu.CompilerParams(dimension_semantics=("parallel",))

    if mask is None:
        grid_spec = pltpu.PrefetchScalarGridSpec(
            num_scalar_prefetch=0, grid=(N,),
            in_specs=qkv_specs, out_specs=out_specs)
        ctx, attn = pl.pallas_call(
            _attention_kernel_nomask, out_shape=out_shape,
            grid_spec=grid_spec, compiler_params=compiler_params,
        )(qh, kh, vh)
    else:
        mask = mask.astype(jnp.float32)
        grid_spec = pltpu.PrefetchScalarGridSpec(
            num_scalar_prefetch=0, grid=(N,),
            in_specs=qkv_specs + [pl.BlockSpec((1, Sq, Sk), lambda n: (n, 0, 0))],
            out_specs=out_specs)
        ctx, attn = pl.pallas_call(
            _attention_kernel_masked, out_shape=out_shape,
            grid_spec=grid_spec, compiler_params=compiler_params,
        )(qh, kh, vh, mask)

    # TODO(synk): for large S, tile queries/keys with an online (flash-style)
    # softmax instead of materializing the full (H, S, S) score tile per batch.
    context = jnp.transpose(ctx, (0, 2, 1, 3))      # (N, Sq, H, Dk) == 'nqhd'
    return context, attn


def scaled_dot_attention_ref(q, k, v, mask, d_k):
    """Pure-JAX f32 reference mirroring the PyTorch forward."""
    hi = jax.lax.Precision.HIGHEST
    score = jnp.einsum("nqhd,nkhd->nhqk", q, k, precision=hi) / math.sqrt(d_k)
    if mask is not None:
        score = jnp.where(mask[:, None, :, :] == 0.0, -jnp.inf, score)
    attn = jax.nn.softmax(score, axis=-1)
    context = jnp.einsum("nhqk,nkhd->nqhd", attn, v, precision=hi)
    return context, attn


if __name__ == "__main__":
    N, S, H, d_k = 2, 8, 4, 8        # d_model = H * d_k = 32, as in the transformer

    key = jax.random.PRNGKey(0)
    kq, kk, kv = jax.random.split(key, 3)
    q = jax.random.normal(kq, (N, S, H, d_k), jnp.float32) * 0.5
    k = jax.random.normal(kk, (N, S, H, d_k), jnp.float32) * 0.5
    v = jax.random.normal(kv, (N, S, H, d_k), jnp.float32) * 0.5

    # attention mask (0 == masked): batch 1 has its last two key positions masked
    mask = jnp.ones((N, S, S), jnp.float32)
    mask = mask.at[1, :, S - 1].set(0.0).at[1, :, S - 2].set(0.0)

    # masked path
    context, attn = scaled_dot_attention(q, k, v, mask)
    context, attn = jax.block_until_ready((context, attn))
    ref_ctx, ref_attn = scaled_dot_attention_ref(q, k, v, mask, d_k)

    assert context.shape == (N, S, H, d_k)
    assert attn.shape == (N, H, S, S)
    assert bool(jnp.all(jnp.isfinite(context)))
    assert bool(jnp.all(jnp.isfinite(attn)))
    ctx_err = float(jnp.max(jnp.abs(context - ref_ctx)))
    attn_err = float(jnp.max(jnp.abs(attn - ref_attn)))
    assert jnp.allclose(context, ref_ctx, rtol=2e-2, atol=2e-2), f"ctx err {ctx_err}"
    assert jnp.allclose(attn, ref_attn, rtol=2e-2, atol=2e-2), f"attn err {attn_err}"

    # mask=None path (dedicated kernel variant, no dummy mask DMA)
    ctx_nm, attn_nm = scaled_dot_attention(q, k, v, None)
    ctx_nm, attn_nm = jax.block_until_ready((ctx_nm, attn_nm))
    ref_ctx_nm, ref_attn_nm = scaled_dot_attention_ref(q, k, v, None, d_k)
    assert jnp.allclose(ctx_nm, ref_ctx_nm, rtol=2e-2, atol=2e-2)
    assert jnp.allclose(attn_nm, ref_attn_nm, rtol=2e-2, atol=2e-2)

    print("KERNEL_OK")
</pallas_src>

<mosaic_0001>
module attributes {stable_mosaic.version = 11 : i64} {
  func.func @_attention_kernel_masked(%arg0: i32, %arg1: memref<1x4x8x8xbf16, #tpu.memory_space<vmem>>, %arg2: memref<1x4x8x8xbf16, #tpu.memory_space<vmem>>, %arg3: memref<1x4x8x8xbf16, #tpu.memory_space<vmem>>, %arg4: memref<1x8x8xf32, #tpu.memory_space<vmem>>, %arg5: memref<1x4x8x8xf32, #tpu.memory_space<vmem>>, %arg6: memref<1x4x8x8xf32, #tpu.memory_space<vmem>>) attributes {dimension_semantics = [#tpu.dimension_semantics<parallel>], iteration_bounds = array<i64: 2>, scalar_prefetch = 0 : i64, scratch_operands = 0 : i64, tpu.core_type = #tpu.core_type<tc>, window_params = [{transform_indices = @transform_0, window_bounds = array<i64: 1, 4, 8, 8>}, {transform_indices = @transform_1, window_bounds = array<i64: 1, 4, 8, 8>}, {transform_indices = @transform_2, window_bounds = array<i64: 1, 4, 8, 8>}, {transform_indices = @transform_3, window_bounds = array<i64: 1, 8, 8>}, {transform_indices = @transform_4, window_bounds = array<i64: 1, 4, 8, 8>}, {transform_indices = @transform_5, window_bounds = array<i64: 1, 4, 8, 8>}]} {
    %c0 = arith.constant 0 : index
    %c0_0 = arith.constant 0 : index
    %c0_1 = arith.constant 0 : index
    %0 = vector.load %arg4[%c0, %c0_0, %c0_1] : memref<1x8x8xf32, #tpu.memory_space<vmem>>, vector<1x8x8xf32>
    %1 = vector.shape_cast %0 : vector<1x8x8xf32> to vector<8x8xf32>
    %cst = arith.constant 0.000000e+00 : f32
    %2 = vector.broadcast %cst : f32 to vector<8x8xf32>
    %3 = arith.cmpf oeq, %1, %2 : vector<8x8xf32>
    %cst_2 = arith.constant -1.000000e+30 : f32
    %cst_3 = arith.constant 0.000000e+00 : f32
    %4 = vector.broadcast %cst_2 : f32 to vector<8x8xf32>
    %5 = vector.broadcast %cst_3 : f32 to vector<8x8xf32>
    %6 = arith.select %3, %4, %5 : vector<8x8xi1>, vector<8x8xf32>
    %c0_4 = arith.constant 0 : index
    %c0_5 = arith.constant 0 : index
    %c0_6 = arith.constant 0 : index
    %c0_7 = arith.constant 0 : index
    %7 = vector.load %arg1[%c0_4, %c0_5, %c0_6, %c0_7] : memref<1x4x8x8xbf16, #tpu.memory_space<vmem>>, vector<1x4x8x8xbf16>
    %8 = vector.shape_cast %7 : vector<1x4x8x8xbf16> to vector<4x8x8xbf16>
    %c0_8 = arith.constant 0 : index
    %c0_9 = arith.constant 0 : index
    %c0_10 = arith.constant 0 : index
    %c0_11 = arith.constant 0 : index
    %9 = vector.load %arg2[%c0_8, %c0_9, %c0_10, %c0_11] : memref<1x4x8x8xbf16, #tpu.memory_space<vmem>>, vector<1x4x8x8xbf16>
    %10 = vector.shape_cast %9 : vector<1x4x8x8xbf16> to vector<4x8x8xbf16>
    %c0_12 = arith.constant 0 : index
    %c0_13 = arith.constant 0 : index
    %c0_14 = arith.constant 0 : index
    %c0_15 = arith.constant 0 : index
    %11 = vector.load %arg3[%c0_12, %c0_13, %c0_14, %c0_15] : memref<1x4x8x8xbf16, #tpu.memory_space<vmem>>, vector<1x4x8x8xbf16>
    %12 = vector.shape_cast %11 : vector<1x4x8x8xbf16> to vector<4x8x8xbf16>
    "tpu.trace_start"() <{level = 10 : i32, message = "hqd,hkd->hqk"}> : () -> ()
    %cst_16 = arith.constant dense<0.000000e+00> : vector<4x8x8xf32>
    %13 = tpu.matmul %8, %10, %cst_16 {dimension_numbers = #tpu.dot_dimension_numbers<[2], [2], [1], [1], [0, 0, 0, 1, 1, 1], [0], [0]>} : vector<4x8x8xbf16>, vector<4x8x8xbf16>, vector<4x8x8xf32> -> vector<4x8x8xf32>
    "tpu.trace_stop"() : () -> ()
    %14 = vector.shape_cast %6 : vector<8x8xf32> to vector<1x8x8xf32>
    %15 = vector.broadcast %14 : vector<1x8x8xf32> to vector<4x8x8xf32>
    %16 = arith.addf %13, %15 : vector<4x8x8xf32>
    %cst_17 = arith.constant dense<0xFF800000> : vector<4x8xf32>
    %17 = vector.multi_reduction <maximumf>, %16, %cst_17 [2] : vector<4x8x8xf32> to vector<4x8xf32>
    %18 = vector.shape_cast %17 : vector<4x8xf32> to vector<4x8x1xf32>
    %19 = vector.broadcast %18 : vector<4x8x1xf32> to vector<4x8x8xf32>
    %20 = arith.subf %16, %19 : vector<4x8x8xf32>
    %21 = math.exp %20 : vector<4x8x8xf32>
    %cst_18 = arith.constant dense<0.000000e+00> : vector<4x8xf32>
    %22 = vector.multi_reduction <add>, %21, %cst_18 [2] : vector<4x8x8xf32> to vector<4x8xf32>
    %23 = vector.shape_cast %22 : vector<4x8xf32> to vector<4x8x1xf32>
    %24 = tpu.reciprocal %23 {approx = true} : vector<4x8x1xf32> -> vector<4x8x1xf32>
    %25 = vector.broadcast %24 : vector<4x8x1xf32> to vector<4x8x8xf32>
    %26 = arith.mulf %21, %25 : vector<4x8x8xf32>
    %c0_19 = arith.constant 0 : index
    %c0_20 = arith.constant 0 : index
    %c0_21 = arith.constant 0 : index
    %c0_22 = arith.constant 0 : index
    %27 = vector.load %arg6[%c0_19, %c0_20, %c0_21, %c0_22] : memref<1x4x8x8xf32, #tpu.memory_space<vmem>>, vector<1x4x8x8xf32>
    %28 = vector.shape_cast %27 : vector<1x4x8x8xf32> to vector<4x8x8xf32>
    %29 = vector.shape_cast %26 : vector<4x8x8xf32> to vector<1x4x8x8xf32>
    tpu.vector_store %arg6[%c0_19, %c0_20, %c0_21, %c0_22], %29 {strides = array<i32>} : memref<1x4x8x8xf32, #tpu.memory_space<vmem>>, vector<1x4x8x8xf32>,
    %30 = arith.truncf %26 : vector<4x8x8xf32> to vector<4x8x8xbf16>
    "tpu.trace_start"() <{level = 10 : i32, message = "hqk,hkd->hqd"}> : () -> ()
    %cst_23 = arith.constant dense<0.000000e+00> : vector<4x8x8xf32>
    %31 = tpu.matmul %30, %12, %cst_23 {dimension_numbers = #tpu.dot_dimension_numbers<[2], [1], [1], [2], [0, 0, 0, 1, 1, 2], [0], [0]>} : vector<4x8x8xbf16>, vector<4x8x8xbf16>, vector<4x8x8xf32> -> vector<4x8x8xf32>
    "tpu.trace_stop"() : () -> ()
    %c0_24 = arith.constant 0 : index
    %c0_25 = arith.constant 0 : index
    %c0_26 = arith.constant 0 : index
    %c0_27 = arith.constant 0 : index
    %32 = vector.load %arg5[%c0_24, %c0_25, %c0_26, %c0_27] : memref<1x4x8x8xf32, #tpu.memory_space<vmem>>, vector<1x4x8x8xf32>
    %33 = vector.shape_cast %32 : vector<1x4x8x8xf32> to vector<4x8x8xf32>
    %34 = vector.shape_cast %31 : vector<4x8x8xf32> to vector<1x4x8x8xf32>
    tpu.vector_store %arg5[%c0_24, %c0_25, %c0_26, %c0_27], %34 {strides = array<i32>} : memref<1x4x8x8xf32, #tpu.memory_space<vmem>>, vector<1x4x8x8xf32>,
    return
  }
  func.func @transform_0(%arg0: i32) -> (i32, i32, i32, i32) {
    %c0_i32 = arith.constant 0 : i32
    %c0_i32_0 = arith.constant 0 : i32
    %c0_i32_1 = arith.constant 0 : i32
    %c0_i32_2 = arith.constant 0 : i32
    return %arg0, %c0_i32, %c0_i32_0, %c0_i32_1 : i32, i32, i32, i32
  }
  func.func @transform_1(%arg0: i32) -> (i32, i32, i32, i32) {
    %c0_i32 = arith.constant 0 : i32
    %c0_i32_0 = arith.constant 0 : i32
    %c0_i32_1 = arith.constant 0 : i32
    %c0_i32_2 = arith.constant 0 : i32
    return %arg0, %c0_i32, %c0_i32_0, %c0_i32_1 : i32, i32, i32, i32
  }
  func.func @transform_2(%arg0: i32) -> (i32, i32, i32, i32) {
    %c0_i32 = arith.constant 0 : i32
    %c0_i32_0 = arith.constant 0 : i32
    %c0_i32_1 = arith.constant 0 : i32
    %c0_i32_2 = arith.constant 0 : i32
    return %arg0, %c0_i32, %c0_i32_0, %c0_i32_1 : i32, i32, i32, i32
  }
  func.func @transform_3(%arg0: i32) -> (i32, i32, i32) {
    %c0_i32 = arith.constant 0 : i32
    %c0_i32_0 = arith.constant 0 : i32
    %c0_i32_1 = arith.constant 0 : i32
    return %arg0, %c0_i32, %c0_i32_0 : i32, i32, i32
  }
  func.func @transform_4(%arg0: i32) -> (i32, i32, i32, i32) {
    %c0_i32 = arith.constant 0 : i32
    %c0_i32_0 = arith.constant 0 : i32
    %c0_i32_1 = arith.constant 0 : i32
    %c0_i32_2 = arith.constant 0 : i32
    return %arg0, %c0_i32, %c0_i32_0, %c0_i32_1 : i32, i32, i32, i32
  }
  func.func @transform_5(%arg0: i32) -> (i32, i32, i32, i32) {
    %c0_i32 = arith.constant 0 : i32
    %c0_i32_0 = arith.constant 0 : i32
    %c0_i32_1 = arith.constant 0 : i32
    %c0_i32_2 = arith.constant 0 : i32
    return %arg0, %c0_i32, %c0_i32_0, %c0_i32_1 : i32, i32, i32, i32
  }
}

</mosaic_0001>

<bundles_post_ra>
// kernel: tpu_custom_call.1
= control target key start
LH: loop header
LB: loop body
LE: loop exit
PB: predicated region body
PF: predicated region fallthrough
CT: control target
= control target key end

     0   :  { %s1883_s0 = inlined_call_operand.hbm [shape: bf16[2,4,8,8], index: 0, kind: input, shape index: {}]   ;;  %s1884_s1 = inlined_call_operand.hbm [shape: bf16[2,4,8,8], index: 1, kind: input, shape index: {}]   ;;  %s1885_s2 = inlined_call_operand.hbm [shape: bf16[2,4,8,8], index: 2, kind: input, shape index: {}]   ;;  %s1886_s3 = inlined_call_operand.hbm [shape: f32[2,8,8], index: 3, kind: input, shape index: {}]   ;;  %s1887_s4 = inlined_call_operand.hbm [shape: f32[2,4,8,8], index: 4, kind: output, shape index: {0}]   ;;  %s1888_s5 = inlined_call_operand.hbm [shape: f32[2,4,8,8], index: 5, kind: output, shape index: {1}]  }
   0x1   :  { %1897 = sst [smem:[#allocation20_spill]] %s1883_s0 }
   0x2   :  { %1898 = sst [smem:[#allocation21_spill]] %s1884_s1 }
   0x3   :  { %11 = vsyncpa [#allocation3], 0 }
   0x4   :  { %13 = vsyncpa [#allocation3 + $0x1], 0 }
   0x5   :  { %14 = vsyncpa [#allocation6], 0 }
   0x6   :  { %16 = vsyncpa [#allocation6 + $0x1], 0 }
   0x7   :  { %17 = vsyncpa [#allocation9], 0 }
   0x8   :  { %19 = vsyncpa [#allocation9 + $0x1], 0 }
   0x9   :  { %20 = vsyncpa [#allocation4], 0 }
   0xa   :  { %22 = vsyncpa [#allocation4 + $0x1], 0 }
   0xb   :  { %23 = vsyncpa [#allocation12], 0 }
   0xc   :  { %25 = vsyncpa [#allocation12 + $0x1], 0  ;;  %s1480_s18 = smov 0   ;;  %s1482_s19 = smov 0  }
   0xd   :  { %s1484_s20 = smov 0   ;;  %s1486_s21 = smov 0  }
   0xe LB: > { %1899 = sst [smem:[#allocation18_spill]] %s1432_s20  ;;  %s1501_s22 = sadd.s32 4294967295, %s1436_s21   ;;  %s1436_s21 = sphi %s1486_s21, %s1922_s21   ;;  %s1432_s20 = sphi %s1484_s20, %s1919_s20   ;;  %s1428_s19 = sphi %s1482_s19, %s1921_s19   ;;  %s1424_s18 = sphi %s1480_s18, %s1920_s18  }
   0xf   : > { %s1016_s23 = sadd.s32 4294967294, %s1436_s21   ;;  %s1505_s24 = sadd.s32 1, %s1436_s21  }
  0x10   : > { %s38_s25 = sadd.s32 1, %s1432_s20  ;;  %s35_s26 = ssub.s32 %s1436_s21, %s1505_s24 }
  0x11   : > { %p45_p0 = scmp.ne.s32.totalorder %s1432_s20, %s1428_s19  ;;  %p36_p1 = scmp.eq.s32.totalorder %s35_s26, 0 }
  0x12   : > { %p46_p2 = scmp.eq.s32.totalorder %s1436_s21, 0  ;;  %p51_p3 = scmp.ne.s32.totalorder %s1428_s19, %s1424_s18 }
  0x13   : > { %p52_p4 = scmp.eq.s32.totalorder %s1501_s22, 0  ;;  %p153_p7 = scmp.eq.s32.totalorder %s1501_s22, 1 }
  0x14   : > { %s1517_s27 = scalar_select %p36_p1, %s1432_s20, %s38_s25  }
  0x15   : > { %p47_p5 = por %p46_p2, %p45_p0  ;;  %p1519_p6 = por %p52_p4, %p51_p3 }
  0x16   : > { %1900 = sst [smem:[#allocation19_spill]] %s1517_s27  ;;  %p159_p8 = scmp.eq.s32.totalorder %s1016_s23, 1 }
  0x17   : > { %s1901_s28 = scalar_select %p1519_p6, 1, 0 }
  0x18   : > { %p1154_p10 = scmp.lt.s32.totalorder %s1436_s21, 2  ;;  %p1526_p11 = por %p153_p7, %p45_p0 }
  0x19   : > { %p1530_p12 = por %p159_p8, %p51_p3  ;;  %s1535_s6 = sand.u32 1, %s1432_s20  }
  0x1a   : > { %s1902_s29 = scalar_select %p1526_p11, 1, 0 }
  0x1b   : > { %s1903_s30 = scalar_select %p1530_p12, 1, 0 }
  0x1c   : > { %s1538_s7 = sshll.u32 %s1436_s21, 8  ;;  %s1541_s8 = sshll.u32 %s1535_s6, 4 }
  0x1d   : > { %p1543_p13 = pnand %p1154_p10, %p47_p5  ;;  %s226_s10 = sand.u32 1, %s1436_s21  }
  0x1e   : > { %s1905_s1 = sld [smem:[#allocation21_spill]]  ;;  %s230_s14 = scalar_lea.vmem [#allocation5], %s1541_s8 }
  0x1f   : > { %s1904_s9 = scalar_select %p1543_p13, 1, 0 }
  0x20   : > { %s237_s15 = sshll.u32 %s230_s14, 4  ;;  %s1558_s16 = scalar_lea.sflag [#allocation6], %s226_s10  ;;  %s1555_s15 = int_to_ptr.vmem [resolvable:$true] %s237_s15 }
  0x21   : > { %p1564_p2 = pneg %p1543_p13 }
  0x24   : > { %s1552_s13 = scalar_lea.hbm %s1905_s1, %s1538_s7  ;;  %s1215_s11 = scalar_lea.hbm %s1905_s1, 512 }
  0x25   : > { %s1210_s17 = scalar_lea.hbm %s1552_s13, 256  ;;  %p1216_p5 = scmp.lt.u32.totalorder %s1552_s13, %s1905_s1 }
  0x26   : > { %p1211_p1 = scmp.ne.s32.totalorder %s1552_s13, %s1210_s17  ;;  %p1217_p7 = scmp.lt.u32.totalorder %s1215_s11, %s1210_s17 }
  0x27   : > { %p1219_p10 = scmp.lt.u32.totalorder %s1210_s17, %s1552_s13 }
  0x28   : > { %p1213_p3 = pnand %p1564_p2, %p1211_p1  ;;  %p1218_p8 = por %p1217_p7, %p1216_p5 }
  0x2a   : > { %p1214_p4 = pneg %p1213_p3  ;;  %p1220_p9 = por %p1219_p10, %p1218_p8 }
  0x2c   : > { %p1221_p0 = pnand %p1220_p9, %p1214_p4 }
  0x2e   : > { %1224 = shalt.err (!%p1221_p0)
}
  0x2f   : > { %s1225_s10 = scalar_lea.vmem %s1555_s15, 256  ;;  %s1438_s25 = smov [#allocation5]  }
  0x30   : > { %p1226_p1 = scmp.ne.s32.totalorder %s1555_s15, %s1225_s10  ;;  %s1230_s26 = sshll.u32 %s1438_s25, 4  ;;  %s1231_s26 = int_to_ptr.vmem [resolvable:$false] %s1230_s26 }
  0x31   : > { %s1232_s12 = scalar_lea.vmem %s1231_s26, 512  ;;  %p1233_p11 = scmp.lt.s32.totalorder %s1555_s15, %s1231_s26 }
  0x32   : > { %p1228_p3 = pnand %p1226_p1, %p1564_p2  ;;  %p1234_p6 = scmp.lt.s32.totalorder %s1232_s12, %s1225_s10 }
  0x34   : > { %p1229_p12 = pneg %p1228_p3  ;;  %p1235_p5 = por %p1234_p6, %p1233_p11 }
  0x36   : > { %p1236_p7 = pnand %p1235_p5, %p1229_p12 }
  0x38   : > { %1239 = shalt.err (!%p1236_p7)
}
  0x39   : > { %s1891_s17 = smov 64   ;;  %s1893_s11 = smov 4  }
  0x3a   : > { %1140 = dma.hbm_to_vmem [thread:$0]  (!%p1543_p13), %s1552_s13, 256, %s1555_s15, %s1558_s16, %s1891_s17, %s1891_s17, %s1893_s11  }
  0x3b   : > { %p284_p6 = scmp.lt.s32.totalorder %s1436_s21, 3  ;;  %s1907_s0 = sld [smem:[#allocation20_spill]] }
  0x3c   : > { %p1908_p9 = scmp.ge.s32.totalorder %s1436_s21, 1  ;;  %s209_s12 = scalar_lea.vmem [#allocation2], %s1541_s8 }
  0x3d   : > { %s216_s1 = sshll.u32 %s209_s12, 4  ;;  %s206_s13 = scalar_lea.sflag [#allocation3], %s1535_s6  ;;  %s1605_s1 = int_to_ptr.vmem [resolvable:$true] %s216_s1 }
  0x3e   : > { %p1600_p11 = pnand %p1908_p9, %p284_p6 }
  0x40   : > { %s1909_s26 = scalar_select %p1600_p11, 1, 0 }
  0x41   : > { %s1596_s25 = scalar_lea.hbm %s1907_s0, %s1538_s7  ;;  %s1245_s17 = scalar_lea.hbm %s1907_s0, 512 }
  0x42   : > { %s1240_s15 = scalar_lea.hbm %s1596_s25, 256  ;;  %p1246_p8 = scmp.lt.u32.totalorder %s1596_s25, %s1907_s0 }
  0x43   : > { %p1241_p12 = scmp.ne.s32.totalorder %s1596_s25, %s1240_s15  ;;  %p1247_p10 = scmp.lt.u32.totalorder %s1245_s17, %s1240_s15 }
  0x44   : > { %p1249_p3 = scmp.lt.u32.totalorder %s1240_s15, %s1596_s25 }
  0x45   : > { %p1243_p0 = pnand %p1241_p12, %p1564_p2  ;;  %p1248_p1 = por %p1247_p10, %p1246_p8 }
  0x47   : > { %p1244_p4 = pneg %p1243_p0  ;;  %p1250_p5 = por %p1249_p3, %p1248_p1 }
  0x49   : > { %p1251_p7 = pnand %p1250_p5, %p1244_p4 }
  0x4b   : > { %1254 = shalt.err (!%p1251_p7)
}
  0x4c   : > { %s1255_s12 = scalar_lea.vmem %s1605_s1, 256  ;;  %s1441_s14 = smov [#allocation2]  }
  0x4d   : > { %p1256_p6 = scmp.ne.s32.totalorder %s1605_s1, %s1255_s12  ;;  %s1260_s10 = sshll.u32 %s1441_s14, 4  ;;  %s1261_s10 = int_to_ptr.vmem [resolvable:$false] %s1260_s10 }
  0x4e   : > { %s1262_s27 = scalar_lea.vmem %s1261_s10, 512  ;;  %p1263_p0 = scmp.lt.s32.totalorder %s1605_s1, %s1261_s10 }
  0x4f   : > { %p1258_p9 = pnand %p1256_p6, %p1564_p2  ;;  %p1264_p11 = scmp.lt.s32.totalorder %s1262_s27, %s1255_s12 }
  0x51   : > { %p1259_p12 = pneg %p1258_p9  ;;  %p1265_p8 = por %p1264_p11, %p1263_p0 }
  0x53   : > { %p1266_p10 = pnand %p1265_p8, %p1259_p12 }
  0x55   : > { %1269 = shalt.err (!%p1266_p10)
}
  0x56   : > { %s1910_s17 = smov 4   ;;  %s1911_s11 = smov 64  }
  0x57   : > { %1137 = dma.hbm_to_vmem [thread:$0]  (!%p1543_p13), %s1596_s25, 256, %s1605_s1, %s206_s13, %s1911_s11, %s1911_s11, %s1910_s17  }
  0x58   : > { %s1638_s12 = scalar_lea.hbm %s1885_s2, %s1538_s7  ;;  %s251_s10 = scalar_lea.vmem [#allocation7], %s1541_s8 }
  0x59   : > { %s258_s27 = sshll.u32 %s251_s10, 4  ;;  %s1270_s0 = scalar_lea.hbm %s1638_s12, 256  ;;  %s1641_s27 = int_to_ptr.vmem [resolvable:$true] %s258_s27 }
  0x5a   : > { %p1271_p11 = scmp.ne.s32.totalorder %s1638_s12, %s1270_s0  ;;  %s1275_s25 = scalar_lea.hbm %s1885_s2, 512 }
  0x5b   : > { %p1276_p3 = scmp.lt.u32.totalorder %s1638_s12, %s1885_s2  ;;  %p1277_p5 = scmp.lt.u32.totalorder %s1275_s25, %s1270_s0 }
  0x5c   : > { %p1273_p4 = pnand %p1271_p11, %p1564_p2  ;;  %p1279_p6 = scmp.lt.u32.totalorder %s1270_s0, %s1638_s12 }
  0x5d   : > { %p1278_p7 = por %p1277_p5, %p1276_p3 }
  0x5e   : > { %p1274_p1 = pneg %p1273_p4 }
  0x5f   : > { %p1280_p9 = por %p1279_p6, %p1278_p7 }
  0x61   : > { %p1281_p12 = pnand %p1280_p9, %p1274_p1 }
  0x63   : > { %1284 = shalt.err (!%p1281_p12)
}
  0x64   : > { %s1285_s8 = scalar_lea.vmem %s1641_s27, 256  ;;  %s1442_s20 = smov [#allocation7]  }
  0x65   : > { %p1286_p0 = scmp.ne.s32.totalorder %s1641_s27, %s1285_s8  ;;  %s1290_s15 = sshll.u32 %s1442_s20, 4  ;;  %s1291_s15 = int_to_ptr.vmem [resolvable:$false] %s1290_s15 }
  0x66   : > { %s1292_s14 = scalar_lea.vmem %s1291_s15, 512  ;;  %p1293_p11 = scmp.lt.s32.totalorder %s1641_s27, %s1291_s15 }
  0x67   : > { %p1288_p8 = pnand %p1286_p0, %p1564_p2  ;;  %p1294_p4 = scmp.lt.s32.totalorder %s1292_s14, %s1285_s8 }
  0x69   : > { %p1289_p10 = pneg %p1288_p8  ;;  %p1295_p3 = por %p1294_p4, %p1293_p11 }
  0x6b   : > { %p1296_p5 = pnand %p1295_p3, %p1289_p10 }
  0x6d   : > { %1299 = shalt.err (!%p1296_p5)
}
  0x6e   : > { %1143 = dma.hbm_to_vmem [thread:$0]  (!%p1543_p13), %s1638_s12, 256, %s1641_s27, %s1558_s16, %s1911_s11, %s1911_s11, %s1910_s17  }
  0x6f   : > { %s1028_s0 = sshll.u32 %s1535_s6, 3  ;;  %s1029_s10 = sshll.u32 %s1436_s21, 7 }
  0x70   : > { %s1673_s13 = scalar_lea.hbm %s1886_s3, %s1029_s10  ;;  %s272_s7 = scalar_lea.vmem [#allocation8], %s1028_s0 }
  0x71   : > { %s279_s8 = sshll.u32 %s272_s7, 4  ;;  %s269_s20 = scalar_lea.sflag [#allocation9], %s1535_s6  ;;  %s280_s8 = int_to_ptr.vmem [resolvable:$true] %s279_s8 }
  0x72   : > { %s1300_s15 = scalar_lea.hbm %s1673_s13, 128  ;;  %s1305_s11 = scalar_lea.hbm %s1886_s3, 256 }
  0x73   : > { %p1301_p1 = scmp.ne.s32.totalorder %s1673_s13, %s1300_s15  ;;  %p1306_p9 = scmp.lt.u32.totalorder %s1673_s13, %s1886_s3 }
  0x74   : > { %p1307_p12 = scmp.lt.u32.totalorder %s1305_s11, %s1300_s15  ;;  %p1309_p8 = scmp.lt.u32.totalorder %s1300_s15, %s1673_s13 }
  0x75   : > { %p1303_p7 = pnand %p1301_p1, %p1564_p2 }
  0x76   : > { %p1308_p0 = por %p1307_p12, %p1306_p9 }
  0x77   : > { %p1304_p6 = pneg %p1303_p7 }
  0x78   : > { %p1310_p10 = por %p1309_p8, %p1308_p0 }
  0x7a   : > { %p1311_p11 = pnand %p1310_p10, %p1304_p6 }
  0x7c   : > { %1314 = shalt.err (!%p1311_p11)
}
  0x7d   : > { %s1315_s6 = scalar_lea.vmem %s280_s8, 128  ;;  %s1443_s14 = smov [#allocation8]  }
  0x7e   : > { %p1316_p4 = scmp.ne.s32.totalorder %s280_s8, %s1315_s6  ;;  %s1320_s0 = sshll.u32 %s1443_s14, 4  ;;  %s1321_s0 = int_to_ptr.vmem [resolvable:$false] %s1320_s0 }
  0x7f   : > { %s1322_s10 = scalar_lea.vmem %s1321_s0, 256  ;;  %p1323_p1 = scmp.lt.s32.totalorder %s280_s8, %s1321_s0 }
  0x80   : > { %p1318_p3 = pnand %p1316_p4, %p1564_p2  ;;  %p1324_p7 = scmp.lt.s32.totalorder %s1322_s10, %s1315_s6 }
  0x82   : > { %p1319_p5 = pneg %p1318_p3  ;;  %p1325_p13 = por %p1324_p7, %p1323_p1 }
  0x84   : > { %p1326_p9 = pnand %p1325_p13, %p1319_p5 }
  0x86   : > { %1329 = shalt.err (!%p1326_p9)
}
  0x87   : > { %p1912_p12 = scmp.ne.s32.totalorder %s1904_s9, 0  ;;  %p1913_p6 = scmp.ne.s32.totalorder %s1909_s26, 0 }
  0x88   : > { %s1696_s23 = sand.u32 (!%p1913_p6), 1, %s1428_s19   ;;  %p1914_p2 = scmp.ne.s32.totalorder (!%p1913_p6), %s1901_s28, 0 }
  0x89   : > { %1146 = dma.hbm_to_vmem [thread:$0]  (!%p1912_p12), %s1673_s13, 128, %s280_s8, %s269_s20  }
  0x8a   : > { %288 = sbr.rel (%p1913_p6) target bundleno = 931 (0x3a3), region = 36  ;;  %s1031_s1 = sshll.u32 (!%p1913_p6), %s1696_s23, 4 }
  0x8b   : > { %s291_s25 = scalar_lea.sflag (!%p1913_p6), [#allocation3], %s1696_s23  ;;  %s1700_s7 = scalar_lea.vmem (!%p1913_p6), [#allocation2], %s1031_s1 }
  0x91   : > { %1403 = dma.done.wait (%p1914_p2), %s291_s25, 256  }
  0x92   : > { %1405 = vsyncadd (%p1914_p2), %s291_s25, 4294967040  ;;  %s299_s9 = sand.u32 1, %s1501_s22   ;;  %s303_s13 = scalar_lea.vmem [#allocation5], %s1031_s1 }
  0x93   : > { %s300_s26 = scalar_lea.sflag [#allocation6], %s299_s9 }
  0x94   : > { %1407 = dma.done.wait (%p1914_p2), %s300_s26, 512  }
  0x95   : > { %1409 = vsyncadd (%p1914_p2), %s300_s26, 4294966784  ;;  %s1034_s8 = sshll.u32 %s1696_s23, 3  ;;  %s1712_s20 = scalar_lea.vmem [#allocation7], %s1031_s1 }
  0x96   : > { %s318_s15 = scalar_lea.sflag [#allocation9], %s1696_s23  ;;  %s1715_s16 = scalar_lea.vmem [#allocation8], %s1034_s8 }
  0x97   : > { %1411 = dma.done.wait (%p1914_p2), %s318_s15, 128  }
  0x98   : > { %1413 = vsyncadd (%p1914_p2), %s318_s15, 4294967168  ;;  %v1444_v0 = vmov 0.0   ;;  %vm1445_vm0 = vmmov 0   ;;  %vm384_vm1 = vcmask 64512   ;;  %v376_v1 = vld [vmem:[%s303_s13] sm:$0xf] }
  0x99   : > { %1074 = vmatprep.subr.bf16.mxu0 %v1444_v0  ;;  %1080 = vmatprep.subr.bf16.mxu1 %v1444_v0  ;;  %v377_v2 = vld [vmem:[%s303_s13 + $0x4] sm:$0xf]  ;;  %v389_v3 = vsel %vm384_vm1, %v376_v1, 0  ;;  %v378_v5 = vld [vmem:[%s303_s13 + $0x8] sm:$0xf]  ;;  %vm624_vm3 = vcmask 1043456  }
  0x9a   : > { %1076 = vmatprep.mubr.msk.bf16.mxu0 %vm1445_vm0, %v1444_v0  ;;  %1082 = vmatprep.mubr.msk.bf16.mxu1 %vm1445_vm0, %v1444_v0  ;;  %v435_v4 = vsel %vm384_vm1, %v377_v2, 0  ;;  %v379_v6 = vld [vmem:[%s303_s13 + $0xc] sm:$0xf]  ;;  %v372_v7 = vld [vmem:[%s1700_s7] sm:$0xf]  ;;  %v481_v9 = vsel %vm384_vm1, %v378_v5, 0 }
  0x9b   : > { %1075 = vmatpush3.bf16.xpose.msra.mxu0 %v389_v3  ;;  %1081 = vmatpush3.bf16.xpose.msra.mxu1 %v435_v4  ;;  %v373_v8 = vld [vmem:[%s1700_s7 + $0x4] sm:$0xf]  ;;  %v527_v10 = vsel %vm384_vm1, %v379_v6, 0  ;;  %v374_v11 = vld [vmem:[%s1700_s7 + $0x8] sm:$0xf]  ;;  %s1035_s28 = sshll.u32 %s1696_s23, 5 }
  0x9c   : > { %1086 = vmatprep.subr.bf16.mxu0 %v1444_v0  ;;  %1092 = vmatprep.subr.bf16.mxu1 %v1444_v0  ;;  %v375_v12 = vld [vmem:[%s1700_s7 + $0xc] sm:$0xf]  ;;  %v369_v13 = vld [vmem:[%s1715_s16] sm:$0xff]  ;;  %v382_v4 = vld [vmem:[%s1712_s20 + $0x8] sm:$0xf]  ;;  %s367_s17 = scalar_lea.vmem [#allocation11], %s1035_s28 }
  0x9d   : > { %vm370_vm2 = vcmp.eq.f32.partialorder %v369_v13, 0.0  ;;  %v380_v59 = vld [vmem:[%s1712_s20] sm:$0xf]  ;;  %v381_v61 = vld [vmem:[%s1712_s20 + $0x4] sm:$0xf]  ;;  %s845_s11 = sshll.u32 %s367_s17, 4  ;;  %s1787_s11 = int_to_ptr.vmem [resolvable:$true] %s845_s11 }
  0x9e   : > { %v371_v14 = vsel %vm370_vm2, -1e+30, %v1444_v0  ;;  %v626_v60 = vsel %vm624_vm3, %v380_v59, 0  ;;  %v672_v62 = vsel %vm624_vm3, %v381_v61, 0  ;;  %s1056_s12 = sshll.u32 %s1501_s22, 9  ;;  %s816_s0 = scalar_lea.sflag [#allocation12], %s1696_s23 }
  0x9f   : > { %s1794_s14 = scalar_lea.hbm %s1888_s5, %s1056_s12  ;;  %s1330_s10 = scalar_lea.vmem %s1787_s11, 512 }
  0xa0   : > { %p1331_p13 = scmp.ne.s32.totalorder %s1787_s11, %s1330_s10  ;;  %p1915_p0 = scmp.ne.s32.totalorder %s1902_s29, 0 }
  0xa1   : > { %s1446_s1 = smov [#allocation11]  }
  0xa2   : > { %1077 = vmatmul.mubr.msk.bf16.vlgmr.msra.gmra.mrb[0].mxu0 %vm384_vm1, %v372_v7  ;;  %1083 = vmatmul.mubr.msk.bf16.vlgmr.msra.gmra.mrb[0].mxu1 %vm384_vm1, %v373_v8  ;;  %v718_v8 = vsel %vm624_vm3, %v382_v4, 0  ;;  %p1332_p8 = pnand %p1331_p13, %p1915_p0  ;;  %s1334_s25 = sshll.u32 %s1446_s1, 4  ;;  %s1335_s25 = int_to_ptr.vmem [resolvable:$false] %s1334_s25 }
  0xa3   : > { %1087 = vmatpush3.bf16.xpose.msra.mxu0 %v481_v9  ;;  %1093 = vmatpush3.bf16.xpose.msra.mxu1 %v527_v10  ;;  %v383_v10 = vld [vmem:[%s1712_s20 + $0xc] sm:$0xf]  ;;  %s1336_s7 = scalar_lea.vmem %s1335_s25, 1024  ;;  %p1337_p11 = scmp.lt.s32.totalorder %s1787_s11, %s1335_s25 }
  0xa4   : > { %1088 = vmatprep.mubr.msk.bf16.mxu0 %vm1445_vm0, %v1444_v0  ;;  %1094 = vmatprep.mubr.msk.bf16.mxu1 %vm1445_vm0, %v1444_v0  ;;  %v764_v13 = vsel %vm624_vm3, %v383_v10, 0  ;;  %p1333_p10 = pneg %p1332_p8  ;;  %p1338_p4 = scmp.lt.s32.totalorder %s1336_s7, %s1330_s10 }
  0xa5   : > { %1098 = vmatprep.subr.bf16.mxu0 %v1444_v0  ;;  %1104 = vmatprep.subr.bf16.mxu1 %v1444_v0 }
  0xa6   : > { %p1339_p3 = por %p1338_p4, %p1337_p11 }
  0xa8   : > { %p1340_p5 = pnand %p1339_p3, %p1333_p10 }
  0xaa   : > { %1089 = vmatmul.mubr.msk.bf16.vlgmr.msra.gmra.mrb[4].mxu0 %vm384_vm1, %v374_v11  ;;  %1095 = vmatmul.mubr.msk.bf16.vlgmr.msra.gmra.mrb[4].mxu1 %vm384_vm1, %v375_v12 }
  0xab   : > { %1100 = vmatprep.mubr.msk.bf16.mxu0 %vm1445_vm0, %v1444_v0  ;;  %1106 = vmatprep.mubr.msk.bf16.mxu1 %vm1445_vm0, %v1444_v0 }
  0xac   : > { %1099 = vmatpush3.bf16.msra.mxu0 %v626_v60  ;;  %1105 = vmatpush3.bf16.msra.mxu1 %v672_v62 }
  0xad   : > { %1110 = vmatprep.subr.bf16.mxu0 %v1444_v0  ;;  %1116 = vmatprep.subr.bf16.mxu1 %v1444_v0 }
 0x175   : > { %v425_v15 = vpop.f32.mrb[0].mxu0  ;;  %v471_v16 = vpop.f32.mrb[0].mxu1 }
 0x176   : > { %v426_v17 = vadd.f32 %v425_v15, %v371_v14  ;;  %v1078_v18 = vpop.f32.mrb[1].mxu0  ;;  %v472_v19 = vadd.f32 %v471_v16, %v371_v14  ;;  %v1084_v20 = vpop.f32.mrb[1].mxu1 }
 0x177   : > { %v428_v21 = vpop.f32.mrb[2].mxu0  ;;  %v474_v22 = vpop.f32.mrb[2].mxu1 }
 0x178   : > { %v1079_v23 = vpop.f32.mrb[3].mxu0  ;;  %v569_v24 = vsel %vm384_vm1, %v426_v17, -inf  ;;  %v1085_v25 = vpop.f32.mrb[3].mxu1  ;;  %v572_v26 = vsel %vm384_vm1, %v472_v19, -inf }
 0x179   : > { %570 = vmax.xlane.f32.xlu0 %v569_v24 }
 0x17d   : > { %v517_v27 = vpop.f32.mrb[4].mxu0  ;;  %573 = vmax.xlane.f32.xlu0 %v572_v26  ;;  %v563_v28 = vpop.f32.mrb[4].mxu1 }
 0x17e   : > { %v518_v29 = vadd.f32 %v517_v27, %v371_v14  ;;  %v1090_v30 = vpop.f32.mrb[5].mxu0  ;;  %v564_v31 = vadd.f32 %v563_v28, %v371_v14  ;;  %v1096_v32 = vpop.f32.mrb[5].mxu1 }
 0x17f   : > { %v520_v33 = vpop.f32.mrb[6].mxu0  ;;  %v566_v34 = vpop.f32.mrb[6].mxu1 }
 0x180   : > { %v1091_v35 = vpop.f32.mrb[7].mxu0  ;;  %v575_v36 = vsel %vm384_vm1, %v518_v29, -inf  ;;  %v1097_v37 = vpop.f32.mrb[7].mxu1  ;;  %v578_v38 = vsel %vm384_vm1, %v564_v31, -inf }
 0x181   : > { %576 = vmax.xlane.f32.xlu1 %v575_v36 }
 0x185   : > { %579 = vmax.xlane.f32.xlu1 %v578_v38 }
 0x206   : > { %v571_v39 = vpop.xlane.xlu0 %570 }
 0x207   : > { %v581_v40 = vsub.f32 %v426_v17, %v571_v39 }
 0x209   : > { %v585_v41 = vmul.f32 1.442695, %v581_v40 }
 0x20a   : > { %v574_v42 = vpop.xlane.xlu0 %573 }
 0x20b   : > { %1194 = vpow2.f32 %v585_v41  ;;  %v582_v43 = vsub.f32 %v472_v19, %v574_v42 }
 0x20d   : > { %v587_v44 = vmul.f32 1.442695, %v582_v43 }
 0x20e   : > { %v577_v45 = vpop.xlane.xlu1 %576 }
 0x20f   : > { %1196 = vpow2.f32 %v587_v44  ;;  %v583_v46 = vsub.f32 %v518_v29, %v577_v45 }
 0x211   : > { %v589_v47 = vmul.f32 1.442695, %v583_v46 }
 0x212   : > { %v580_v48 = vpop.xlane.xlu1 %579 }
 0x213   : > { %1198 = vpow2.f32 %v589_v47  ;;  %v584_v49 = vsub.f32 %v564_v31, %v580_v48 }
 0x215   : > { %v1195_v50 = vpop.eup %1194  ;;  %v591_v51 = vmul.f32 1.442695, %v584_v49 }
 0x216   : > { %v593_v52 = vsel %vm384_vm1, %v1195_v50, 0.0 }
 0x217   : > { %1200 = vpow2.f32 %v591_v51  ;;  %594 = vadd.xlane.f32.xlu0 %v593_v52 }
 0x219   : > { %v1197_v53 = vpop.eup %1196 }
 0x21a   : > { %v596_v54 = vsel %vm384_vm1, %v1197_v53, 0.0 }
 0x21b   : > { %597 = vadd.xlane.f32.xlu1 %v596_v54 }
 0x21d   : > { %v1199_v55 = vpop.eup %1198 }
 0x21e   : > { %v599_v56 = vsel %vm384_vm1, %v1199_v55, 0.0 }
 0x21f   : > { %600 = vadd.xlane.f32.xlu0 %v599_v56 }
 0x221   : > { %v1201_v57 = vpop.eup %1200 }
 0x222   : > { %v602_v58 = vsel %vm384_vm1, %v1201_v57, 0.0 }
 0x223   : > { %603 = vadd.xlane.f32.xlu1 %v602_v58 }
 0x2a4   : > { %v595_v63 = vpop.xlane.xlu0 %594 }
 0x2a5   : > { %1202 = vrcp.f32 %v595_v63 }
 0x2a8   : > { %v598_v1 = vpop.xlane.xlu1 %597 }
 0x2a9   : > { %1204 = vrcp.f32 %v598_v1 }
 0x2ac   : > { %v601_v2 = vpop.xlane.xlu0 %600 }
 0x2ad   : > { %1206 = vrcp.f32 %v601_v2 }
 0x2af   : > { %v1203_v3 = vpop.eup %1202 }
 0x2b0   : > { %v609_v5 = vmul.f32 %v1203_v3, %v1195_v50  ;;  %v604_v6 = vpop.xlane.xlu1 %603 }
 0x2b1   : > { %1208 = vrcp.f32 %v604_v6 }
 0x2b2   : > { %v617_v7 = vpack.c.bf16 %v609_v5, %v609_v5  ;;  %613 = vst.msk [vmem:[%s367_s17] sm:$0xff] %vm384_vm1, %v609_v5 }
 0x2b3   : > { %v1205_v9 = vpop.eup %1204 }
 0x2b4   : > { %v610_v11 = vmul.f32 %v1205_v9, %v1197_v53  ;;  %1101 = vmatmul.mubr.msk.bf16.vlgmr.msra.gmra.mrb[8].mxu0 %vm384_vm1, %v617_v7 }
 0x2b5   : > { %1111 = vmatpush3.bf16.msra.mxu0 %v718_v8  ;;  %1112 = vmatprep.mubr.msk.bf16.mxu0 %vm1445_vm0, %v1444_v0 }
 0x2b6   : > { %v618_v12 = vpack.c.bf16 %v610_v11, %v610_v11  ;;  %614 = vst.msk [vmem:[%s367_s17 + $0x8] sm:$0xff] %vm384_vm1, %v610_v11 }
 0x2b7   : > { %v1207_v14 = vpop.eup %1206 }
 0x2b8   : > { %v611_v15 = vmul.f32 %v1207_v14, %v1199_v55  ;;  %1107 = vmatmul.mubr.msk.bf16.vlgmr.msra.gmra.mrb[8].mxu1 %vm384_vm1, %v618_v12 }
 0x2b9   : > { %1117 = vmatpush3.bf16.msra.mxu1 %v764_v13  ;;  %1118 = vmatprep.mubr.msk.bf16.mxu1 %vm1445_vm0, %v1444_v0 }
 0x2ba   : > { %v619_v16 = vpack.c.bf16 %v611_v15, %v611_v15  ;;  %615 = vst.msk [vmem:[%s367_s17 + $0x10] sm:$0xff] %vm384_vm1, %v611_v15 }
 0x2bb   : > { %v1209_v17 = vpop.eup %1208 }
 0x2bc   : > { %v612_v18 = vmul.f32 %v1209_v17, %v1201_v57  ;;  %1113 = vmatmul.mubr.msk.bf16.vlgmr.msra.gmra.mrb[12].mxu0 %vm384_vm1, %v619_v16 }
 0x2be   : > { %v620_v19 = vpack.c.bf16 %v612_v18, %v612_v18  ;;  %616 = vst.msk [vmem:[%s367_s17 + $0x18] sm:$0xff] %vm384_vm1, %v612_v18 }
 0x2c0   : > { %1119 = vmatmul.mubr.msk.bf16.vlgmr.msra.gmra.mrb[12].mxu1 %vm384_vm1, %v620_v19 }
 0x2c1   : > { %1343 = shalt.err (!%p1340_p5)
}
 0x2c2   : > { %s1344_s9 = scalar_lea.hbm %s1794_s14, 512  ;;  %s1348_s8 = scalar_lea.hbm %s1888_s5, 1024 }
 0x2c3   : > { %p1345_p1 = scmp.ne.s32.totalorder %s1794_s14, %s1344_s9  ;;  %p1349_p12 = scmp.lt.u32.totalorder %s1794_s14, %s1888_s5 }
 0x2c4   : > { %p1350_p6 = scmp.lt.u32.totalorder %s1348_s8, %s1344_s9  ;;  %p1352_p13 = scmp.lt.u32.totalorder %s1344_s9, %s1794_s14 }
 0x2c5   : > { %p1346_p7 = pnand %p1345_p1, %p1915_p0 }
 0x2c6   : > { %p1351_p2 = por %p1350_p6, %p1349_p12 }
 0x2c7   : > { %p1347_p9 = pneg %p1346_p7 }
 0x2c8   : > { %p1353_p8 = por %p1352_p13, %p1351_p2 }
 0x2ca   : > { %p1354_p10 = pnand %p1353_p8, %p1347_p9 }
 0x2cc   : > { %1357 = shalt.err (!%p1354_p10)
}
 0x2cd   : > { %s1447_s16 = smov 128   ;;  %s1448_s17 = smov 8  }
 0x2ce   : > { %1131 = dma.vmem_to_hbm [thread:$0]  (%p1915_p0), %s1787_s11, 512, %s1794_s14, %s816_s0, %s1447_s16, %s1447_s16, %s1448_s17  }
 0x2cf   : > { %s360_s27 = scalar_lea.vmem [#allocation10], %s1035_s28  ;;  %s1835_s14 = scalar_lea.hbm %s1887_s4, %s1056_s12 }
 0x2d0   : > { %s829_s6 = sshll.u32 %s360_s27, 4  ;;  %s811_s0 = scalar_lea.sflag [#allocation4], %s1696_s23  ;;  %s1828_s6 = int_to_ptr.vmem [resolvable:$true] %s829_s6 }
 0x2d1   : > { %s1358_s10 = scalar_lea.vmem %s1828_s6, 512  ;;  %s1449_s1 = smov [#allocation10]  }
 0x2d2   : > { %p1359_p11 = scmp.ne.s32.totalorder %s1828_s6, %s1358_s10  ;;  %s1362_s25 = sshll.u32 %s1449_s1, 4  ;;  %s1363_s25 = int_to_ptr.vmem [resolvable:$false] %s1362_s25 }
 0x2d3   : > { %s1364_s22 = scalar_lea.vmem %s1363_s25, 1024  ;;  %p1365_p5 = scmp.lt.s32.totalorder %s1828_s6, %s1363_s25 }
 0x2d4   : > { %p1360_p4 = pnand %p1359_p11, %p1915_p0  ;;  %p1366_p1 = scmp.lt.s32.totalorder %s1364_s22, %s1358_s10 }
 0x2d6   : > { %p1361_p3 = pneg %p1360_p4  ;;  %p1367_p7 = por %p1366_p1, %p1365_p5 }
 0x2d8   : > { %p1368_p9 = pnand %p1367_p7, %p1361_p3 }
 0x387   : > { %v662_v0 = vpop.f32.mrb[8].mxu0 }
 0x388   : > { %806 = vst.msk [vmem:[%s360_s27] sm:$0xff] %vm384_vm1, %v662_v0  ;;  %v1102_v20 = vpop.f32.mrb[9].mxu0 }
 0x389   : > { %v665_v21 = vpop.f32.mrb[10].mxu0 }
 0x38a   : > { %v1103_v22 = vpop.f32.mrb[11].mxu0 }
 0x38b   : > { %v708_v23 = vpop.f32.mrb[8].mxu1 }
 0x38c   : > { %807 = vst.msk [vmem:[%s360_s27 + $0x8] sm:$0xff] %vm384_vm1, %v708_v23  ;;  %v1108_v24 = vpop.f32.mrb[9].mxu1 }
 0x38d   : > { %v711_v25 = vpop.f32.mrb[10].mxu1 }
 0x38e   : > { %v1109_v26 = vpop.f32.mrb[11].mxu1 }
 0x38f   : > { %v754_v27 = vpop.f32.mrb[12].mxu0 }
 0x390   : > { %808 = vst.msk [vmem:[%s360_s27 + $0x10] sm:$0xff] %vm384_vm1, %v754_v27  ;;  %v1114_v28 = vpop.f32.mrb[13].mxu0 }
 0x391   : > { %v757_v29 = vpop.f32.mrb[14].mxu0 }
 0x392   : > { %v1115_v30 = vpop.f32.mrb[15].mxu0 }
 0x393   : > { %v800_v31 = vpop.f32.mrb[12].mxu1 }
 0x394   : > { %809 = vst.msk [vmem:[%s360_s27 + $0x18] sm:$0xff] %vm384_vm1, %v800_v31  ;;  %v1120_v32 = vpop.f32.mrb[13].mxu1 }
 0x395   : > { %v803_v33 = vpop.f32.mrb[14].mxu1 }
 0x396   : > { %1371 = shalt.err (!%p1368_p9)
}
 0x397   : > { %s1372_s12 = scalar_lea.hbm %s1835_s14, 512  ;;  %s1376_s26 = scalar_lea.hbm %s1887_s4, 1024 }
 0x398   : > { %p1373_p12 = scmp.ne.s32.totalorder %s1835_s14, %s1372_s12  ;;  %p1377_p13 = scmp.lt.u32.totalorder %s1835_s14, %s1887_s4 }
 0x399   : > { %p1378_p8 = scmp.lt.u32.totalorder %s1376_s26, %s1372_s12  ;;  %p1380_p11 = scmp.lt.u32.totalorder %s1372_s12, %s1835_s14 }
 0x39a   : > { %p1374_p6 = pnand %p1373_p12, %p1915_p0 }
 0x39b   : > { %p1379_p10 = por %p1378_p8, %p1377_p13 }
 0x39c   : > { %p1375_p2 = pneg %p1374_p6 }
 0x39d   : > { %p1381_p4 = por %p1380_p11, %p1379_p10 }
 0x39f   : > { %p1382_p3 = pnand %p1381_p4, %p1375_p2 }
 0x3a1   : > { %1385 = shalt.err (!%p1382_p3)
}
 0x3a2   : > { %1130 = dma.vmem_to_hbm [thread:$0]  (%p1915_p0), %s1828_s6, 512, %s1835_s14, %s811_s0, %s1447_s16, %s1447_s16, %s1448_s17   ;;  %v1121_v34 = vpop.f32.mrb[15].mxu1 }
 0x3a3 PF: > { %s860_s20 = sand.u32 1, %s1424_s18   ;;  %p1916_p5 = scmp.ne.s32.totalorder %s1903_s30, 0 }
 0x3a4   : > { %p1917_p1 = scmp.ge.s32.totalorder %s1436_s21, 2  ;;  %s861_s15 = scalar_lea.sflag [#allocation4], %s860_s20 }
 0x3a6   : > { %p1148_p7 = pnand %p1917_p1, %p1916_p5 }
 0x3a8   : > { %1415 = dma.done.wait (!%p1148_p7), %s861_s15, 512  }
 0x3a9   : > { %1417 = vsyncadd (!%p1148_p7), %s861_s15, 4294966784  ;;  %s870_s29 = scalar_lea.sflag [#allocation12], %s860_s20 }
 0x3aa   : > { %1419 = dma.done.wait (!%p1148_p7), %s870_s29, 512  }
 0x3ab   : > { %1421 = vsyncadd (!%p1148_p7), %s870_s29, 4294966784  ;;  %s1918_s23 = sld [smem:[#allocation18_spill]]  ;;  %s1919_s20 = sld [smem:[#allocation19_spill]] }
 0x3ac   : > { %p28_p0 = scmp.ge.s32.totalorder %s1505_s24, 4   ;;  %s1920_s18 = smov %s1428_s19 }
 0x3ad   : > { %s1922_s21 = smov %s1505_s24 }
 0x3ae   :  { %30 = sbr.rel (!%p28_p0) target bundleno = 14 (0xe), region = 135 }
 0x3b1   : > { %s1921_s19 = smov %s1918_s23 }
 0x3b5   :  { %875 = vsyncpa [#allocation3], 1 }
 0x3b6   :  { %877 = vsyncpa [#allocation3 + $0x1], 1 }
 0x3b7   :  { %878 = vsyncpa [#allocation6], 1 }
 0x3b8   :  { %880 = vsyncpa [#allocation6 + $0x1], 1 }
 0x3b9   :  { %881 = vsyncpa [#allocation9], 1 }
 0x3ba   :  { %883 = vsyncpa [#allocation9 + $0x1], 1 }
 0x3bb   :  { %884 = vsyncpa [#allocation4], 1 }
 0x3bc   :  { %886 = vsyncpa [#allocation4 + $0x1], 1 }
 0x3bd   :  { %887 = vsyncpa [#allocation12], 1 }
 0x3be   :  { %889 = vsyncpa [#allocation12 + $0x1], 1 }

</bundles_post_ra>
